<compile_context>
chip_gen: v6e
topology: v6e:2x2x1
jax: 0.10.0
libtpu: 0.0.40
codegen_flags: <defaults>
</compile_context>

<pallas_src>
import functools

import jax
import jax.numpy as jnp
from jax import lax
from jax.experimental import pallas as pl
from jax.experimental.pallas import tpu as pltpu


def _clip_loss_kernel(scale_ref, img_ref, txt_ref,
                      part_ref, col_m_ref, col_l_ref,
                      m_row_ref, l_row_ref, acc_ref,
                      *, col_sum_on_mxu):
    i = pl.program_id(0)                  # image row-block index (outer, "parallel")
    j = pl.program_id(1)                  # text  col-block index (inner, "arbitrary")
    last_j = pl.num_programs(1) - 1
    blk = img_ref.shape[0]

    # ---- per-row-block init (j is the inner, sequential axis) ---------------
    @pl.when(j == 0)
    def _():
        acc_ref[0, 0] = 0.0
        m_row_ref[...] = jnp.full(m_row_ref.shape, -jnp.inf, jnp.float32)
        l_row_ref[...] = jnp.zeros(l_row_ref.shape, jnp.float32)

    # ---- (B, B) logits tile on the MXU; scale applied post-MXU in f32 -------
    scale = scale_ref[0, 0]                                # f32 scalar (never bf16-rounded)
    logits = scale * lax.dot_general(                      # (B, B) f32
        img_ref[...], txt_ref[...],
        dimension_numbers=(((1,), (1,)), ((), ())),        # contract lane axis of both
        preferred_element_type=jnp.float32)

    # ---- online row log-sum-exp (CE over logits_per_image rows) -------------
    m_old = m_row_ref[...]                                 # (B, 1)
    m_new = jnp.maximum(m_old, jnp.max(logits, axis=1, keepdims=True))
    p = jnp.exp(logits - m_new)                            # (B, B)
    l_row_ref[...] = (l_row_ref[...] * jnp.exp(m_old - m_new)
                      + jnp.sum(p, axis=1, keepdims=True))
    m_row_ref[...] = m_new

    # ---- per-tile column stats (CE over logits_per_text rows) ---------------
    # No persistent cross-row-block state: (max, sum-exp) per column of THIS
    # tile go straight to per-(i, j) outputs; merged across i in the wrapper.
    mc = jnp.max(logits, axis=0, keepdims=True)            # (1, B)
    q = jnp.exp(logits - mc)                               # (B, B)
    if col_sum_on_mxu:                                     # MXU column sum (v6e/v7x)
        ones_row = jnp.ones((1, blk), jnp.float32)
        ls = lax.dot_general(ones_row, q,
                             dimension_numbers=(((1,), (0,)), ((), ())),
                             preferred_element_type=jnp.float32)
    else:                                                  # XLU column sum (v5e)
        ls = jnp.sum(q, axis=0, keepdims=True)
    col_m_ref[...] = mc.reshape(col_m_ref.shape)
    col_l_ref[...] = ls.reshape(col_l_ref.shape)

    # ---- diagonal (correct-class) logits straight from the logits tile ------
    @pl.when(i == j)
    def _():
        rows = lax.broadcasted_iota(jnp.int32, logits.shape, 0)
        cols = lax.broadcasted_iota(jnp.int32, logits.shape, 1)
        diag = jnp.sum(jnp.where(rows == cols, logits, 0.0))
        acc_ref[0, 0] += -2.0 * diag

    # ---- fold finished row LSEs; emit this row block's partial scalar -------
    @pl.when(j == last_j)
    def _():
        acc_ref[0, 0] += jnp.sum(m_row_ref[...] + jnp.log(l_row_ref[...]))
        part_ref[...] = jnp.full(part_ref.shape, acc_ref[0, 0], jnp.float32)


def _tile_vmem_bytes(block, d, itemsize):
    feats = 2 * 2 * block * d * itemsize      # image + text tiles, double-buffered
    f32_tmps = 6 * block * block * 4          # logits / p / q f32 temporaries (+ slack)
    return feats + f32_tmps


def _pick_block(n, d, itemsize,
                candidates=(1024, 768, 512, 256, 128, 64, 32, 16, 8),
                vmem_budget_bytes=40 * 2**20):
    # Roofline: the streamed text tile gives ~B MAC/byte in bf16, so B should
    # be >= peak_FLOPs / HBM_BW (~240 v5e, ~650-700 v6e, ~310 v7x).  Pick the
    # largest candidate that divides N and fits the VMEM budget.
    for c in candidates:
        if n % c == 0 and _tile_vmem_bytes(c, d, itemsize) <= vmem_budget_bytes:
            return c
    return n


def _default_col_sum_on_mxu():
    # v5e: weakest MXU, 3 XLUs -> keep the per-tile column sum off the MXU.
    try:
        kind = jax.devices()[0].device_kind.lower()
    except Exception:
        return True
    return "v5" not in kind


def clip_loss(image_features, text_features, logit_scale, *,
              block=None, compute_dtype=jnp.bfloat16, col_sum_on_mxu=None):
    """image_features, text_features: [N, D]; logit_scale: scalar.
    Returns the scalar f32 contrastive loss (world_size == 1 path of ClipLoss)."""
    n, d = image_features.shape
    assert text_features.shape == (n, d), "paired features must have identical shapes"

    if compute_dtype is not None:
        image_features = image_features.astype(compute_dtype)
        text_features = text_features.astype(compute_dtype)
    itemsize = jnp.dtype(image_features.dtype).itemsize

    if block is None:
        block = _pick_block(n, d, itemsize)
    assert n % block == 0, "row/col block must evenly divide the batch"
    nb = n // block

    if col_sum_on_mxu is None:
        col_sum_on_mxu = _default_col_sum_on_mxu()

    scale = jnp.asarray(logit_scale, jnp.float32).reshape(1, 1)
    kernel = functools.partial(_clip_loss_kernel, col_sum_on_mxu=col_sum_on_mxu)

    part, col_m, col_l = pl.pallas_call(
        kernel,
        out_shape=(
            jax.ShapeDtypeStruct((nb, 1, 128), jnp.float32),        # per-row-block partial
            jax.ShapeDtypeStruct((nb, nb, 1, block), jnp.float32),  # per-tile column max
            jax.ShapeDtypeStruct((nb, nb, 1, block), jnp.float32),  # per-tile column sum-exp
        ),
        grid_spec=pltpu.PrefetchScalarGridSpec(
            num_scalar_prefetch=0,
            grid=(nb, nb),                              # (image row blocks, text col blocks)
            in_specs=[
                pl.BlockSpec(memory_space=pltpu.MemorySpace.SMEM),   # logit_scale
                pl.BlockSpec((block, d), lambda i, j: (i, 0)),       # image tile (resident over j)
                pl.BlockSpec((block, d), lambda i, j: (j, 0)),       # text tile (streamed)
            ],
            out_specs=(
                pl.BlockSpec((1, 1, 128), lambda i, j: (i, 0, 0)),
                pl.BlockSpec((1, 1, 1, block), lambda i, j: (i, j, 0, 0)),
                pl.BlockSpec((1, 1, 1, block), lambda i, j: (i, j, 0, 0)),
            ),
            scratch_shapes=[
                pltpu.VMEM((block, 1), jnp.float32),   # row running max
                pltpu.VMEM((block, 1), jnp.float32),   # row running sum
                pltpu.SMEM((1, 1), jnp.float32),       # per-row-block scalar partial
            ],
        ),
        # Row axis carries no cross-block state anymore -> safe to shard across
        # TensorCores (v7x uses both cores); column axis reduces into per-row
        # scratch/outputs so it stays "arbitrary".
        compiler_params=pltpu.CompilerParams(
            dimension_semantics=("parallel", "arbitrary"),
            vmem_limit_bytes=64 * 1024 * 1024,
        ),
    )(scale, image_features, text_features)

    # Tiny JAX epilogue: logsumexp-merge the per-tile column stats across row
    # blocks (O(N^2 / B) work, negligible vs N^2 * D).
    col_m = col_m.reshape(nb, n)
    col_l = col_l.reshape(nb, n)
    m = jnp.max(col_m, axis=0)                                   # (N,)
    l = jnp.sum(col_l * jnp.exp(col_m - m[None, :]), axis=0)     # (N,)
    col_lse_sum = jnp.sum(m + jnp.log(l))
    row_and_diag = jnp.sum(part[:, 0, 0])                        # sum_i [rowLSE_i] - 2*sum diag
    return (row_and_diag + col_lse_sum) / (2.0 * n)


def clip_loss_ref(image_features, text_features, logit_scale):
    # Pure-JAX reference mirroring F.cross_entropy with labels = arange(N).
    logits_i = logit_scale * image_features.astype(jnp.float32) @ text_features.astype(jnp.float32).T
    logits_t = logits_i.T
    labels = jnp.arange(logits_i.shape[0])

    def ce(logits):
        lse = jax.scipy.special.logsumexp(logits, axis=1)
        correct = logits[jnp.arange(logits.shape[0]), labels]
        return jnp.mean(lse - correct)

    return (ce(logits_i) + ce(logits_t)) / 2.0


if __name__ == "__main__":
    key = jax.random.PRNGKey(0)
    k1, k2 = jax.random.split(key)

    N, D = 64, 128  # small paired image/text batch; D maps to the 128-lane axis
    image_features = jax.random.normal(k1, (N, D), dtype=jnp.float32)
    text_features = jax.random.normal(k2, (N, D), dtype=jnp.float32)
    # CLIP-style L2 normalization (as done before calling the loss).
    image_features = image_features / jnp.linalg.norm(image_features, axis=-1, keepdims=True)
    text_features = text_features / jnp.linalg.norm(text_features, axis=-1, keepdims=True)
    logit_scale = jnp.exp(jnp.asarray(0.07, jnp.float32))

    ref = clip_loss_ref(image_features, text_features, logit_scale)

    # f32 compute path: tiled (4x4 grid of 16x16 logit tiles) and single-tile.
    loss_f32_tiled = jax.block_until_ready(
        clip_loss(image_features, text_features, logit_scale,
                  block=16, compute_dtype=jnp.float32))
    loss_f32_single = jax.block_until_ready(
        clip_loss(image_features, text_features, logit_scale,
                  compute_dtype=jnp.float32))
    assert jnp.allclose(loss_f32_tiled, ref, rtol=1e-5, atol=5e-5), (loss_f32_tiled, ref)
    assert jnp.allclose(loss_f32_single, ref, rtol=1e-5, atol=5e-5), (loss_f32_single, ref)

    # Exercise the non-default column-sum unit (MXU vs XLU) as well.
    loss_alt = jax.block_until_ready(
        clip_loss(image_features, text_features, logit_scale, block=32,
                  compute_dtype=jnp.float32,
                  col_sum_on_mxu=not _default_col_sum_on_mxu()))
    assert jnp.allclose(loss_alt, ref, rtol=1e-5, atol=5e-5), (loss_alt, ref)

    # Default bf16 compute path (halves streamed bytes; full-rate MXU).
    loss_bf16 = jax.block_until_ready(
        clip_loss(image_features, text_features, logit_scale, block=16))
    assert jnp.allclose(loss_bf16, ref, rtol=2e-2, atol=5e-2), (loss_bf16, ref)

    print("KERNEL_OK")
</pallas_src>

<mosaic_0001>
module attributes {stable_mosaic.version = 11 : i64} {
  func.func @_clip_loss_kernel(%arg0: i32, %arg1: i32, %arg2: memref<1x1xf32, #tpu.memory_space<smem>>, %arg3: memref<16x128xf32, #tpu.memory_space<vmem>>, %arg4: memref<16x128xf32, #tpu.memory_space<vmem>>, %arg5: memref<1x1x128xf32, #tpu.memory_space<vmem>>, %arg6: memref<1x1x1x16xf32, #tpu.memory_space<vmem>>, %arg7: memref<1x1x1x16xf32, #tpu.memory_space<vmem>>, %arg8: memref<16x1xf32, #tpu.memory_space<vmem>>, %arg9: memref<16x1xf32, #tpu.memory_space<vmem>>, %arg10: memref<1x1xf32, #tpu.memory_space<smem>>) attributes {dimension_semantics = [#tpu.dimension_semantics<parallel>, #tpu.dimension_semantics<arbitrary>], iteration_bounds = array<i64: 4, 4>, scalar_prefetch = 0 : i64, scratch_operands = 3 : i64, tpu.core_type = #tpu.core_type<tc>, window_params = [{transform_indices = @transform_0, window_bounds = array<i64: 1, 1>}, {transform_indices = @transform_1, window_bounds = array<i64: 16, 128>}, {transform_indices = @transform_2, window_bounds = array<i64: 16, 128>}, {transform_indices = @transform_3, window_bounds = array<i64: 1, 1, 128>}, {transform_indices = @transform_4, window_bounds = array<i64: 1, 1, 1, 16>}, {transform_indices = @transform_5, window_bounds = array<i64: 1, 1, 1, 16>}]} {
    %c0_i32 = arith.constant 0 : i32
    %0 = arith.cmpi eq, %arg1, %c0_i32 : i32
    %1 = arith.extui %0 : i1 to i32
    %c0_i32_0 = arith.constant 0 : i32
    %2 = arith.cmpi ne, %1, %c0_i32_0 : i32
    scf.if %2 {
      %cst_29 = arith.constant 0.000000e+00 : f32
      %c0_30 = arith.constant 0 : index
      %c0_31 = arith.constant 0 : index
      %42 = memref.load %arg10[%c0_30, %c0_31] : memref<1x1xf32, #tpu.memory_space<smem>>
      memref.store %cst_29, %arg10[%c0_30, %c0_31] : memref<1x1xf32, #tpu.memory_space<smem>>
      %cst_32 = arith.constant 0xFF800000 : f32
      %43 = vector.broadcast %cst_32 : f32 to vector<16x1xf32>
      %c0_33 = arith.constant 0 : index
      %c0_34 = arith.constant 0 : index
      %44 = vector.load %arg8[%c0_33, %c0_34] : memref<16x1xf32, #tpu.memory_space<vmem>>, vector<16x1xf32>
      tpu.vector_store %arg8[%c0_33, %c0_34], %43 {strides = array<i32>} : memref<16x1xf32, #tpu.memory_space<vmem>>, vector<16x1xf32>,
      %cst_35 = arith.constant 0.000000e+00 : f32
      %45 = vector.broadcast %cst_35 : f32 to vector<16x1xf32>
      %c0_36 = arith.constant 0 : index
      %c0_37 = arith.constant 0 : index
      %46 = vector.load %arg9[%c0_36, %c0_37] : memref<16x1xf32, #tpu.memory_space<vmem>>, vector<16x1xf32>
      tpu.vector_store %arg9[%c0_36, %c0_37], %45 {strides = array<i32>} : memref<16x1xf32, #tpu.memory_space<vmem>>, vector<16x1xf32>,
    } else {
    }
    %c0 = arith.constant 0 : index
    %c0_1 = arith.constant 0 : index
    %3 = memref.load %arg2[%c0, %c0_1] : memref<1x1xf32, #tpu.memory_space<smem>>
    %c0_2 = arith.constant 0 : index
    %c0_3 = arith.constant 0 : index
    %4 = vector.load %arg3[%c0_2, %c0_3] : memref<16x128xf32, #tpu.memory_space<vmem>>, vector<16x128xf32>
    %c0_4 = arith.constant 0 : index
    %c0_5 = arith.constant 0 : index
    %5 = vector.load %arg4[%c0_4, %c0_5] : memref<16x128xf32, #tpu.memory_space<vmem>>, vector<16x128xf32>
    %cst = arith.constant dense<0.000000e+00> : vector<16x16xf32>
    %6 = tpu.matmul %4, %5, %cst {dimension_numbers = #tpu.dot_dimension_numbers<[1], [1], [0], [0], [0, 0, 1, 0], [], []>} : vector<16x128xf32>, vector<16x128xf32>, vector<16x16xf32> -> vector<16x16xf32>
    %7 = vector.broadcast %3 : f32 to vector<16x16xf32>
    %8 = arith.mulf %7, %6 : vector<16x16xf32>
    %c0_6 = arith.constant 0 : index
    %c0_7 = arith.constant 0 : index
    %9 = vector.load %arg8[%c0_6, %c0_7] : memref<16x1xf32, #tpu.memory_space<vmem>>, vector<16x1xf32>
    %cst_8 = arith.constant dense<0xFF800000> : vector<16xf32>
    %10 = vector.multi_reduction <maximumf>, %8, %cst_8 [1] : vector<16x16xf32> to vector<16xf32>
    %11 = vector.shape_cast %10 : vector<16xf32> to vector<16x1xf32>
    %12 = arith.maximumf %9, %11 : vector<16x1xf32>
    %13 = vector.broadcast %12 : vector<16x1xf32> to vector<16x16xf32>
    %14 = arith.subf %8, %13 : vector<16x16xf32>
    %15 = math.exp %14 : vector<16x16xf32>
    %c0_9 = arith.constant 0 : index
    %c0_10 = arith.constant 0 : index
    %16 = vector.load %arg9[%c0_9, %c0_10] : memref<16x1xf32, #tpu.memory_space<vmem>>, vector<16x1xf32>
    %17 = arith.subf %9, %12 : vector<16x1xf32>
    %18 = math.exp %17 : vector<16x1xf32>
    %19 = arith.mulf %16, %18 : vector<16x1xf32>
    %cst_11 = arith.constant dense<0.000000e+00> : vector<16xf32>
    %20 = vector.multi_reduction <add>, %15, %cst_11 [1] : vector<16x16xf32> to vector<16xf32>
    %21 = vector.shape_cast %20 : vector<16xf32> to vector<16x1xf32>
    %22 = arith.addf %19, %21 : vector<16x1xf32>
    %c0_12 = arith.constant 0 : index
    %c0_13 = arith.constant 0 : index
    %23 = vector.load %arg9[%c0_12, %c0_13] : memref<16x1xf32, #tpu.memory_space<vmem>>, vector<16x1xf32>
    tpu.vector_store %arg9[%c0_12, %c0_13], %22 {strides = array<i32>} : memref<16x1xf32, #tpu.memory_space<vmem>>, vector<16x1xf32>,
    %c0_14 = arith.constant 0 : index
    %c0_15 = arith.constant 0 : index
    %24 = vector.load %arg8[%c0_14, %c0_15] : memref<16x1xf32, #tpu.memory_space<vmem>>, vector<16x1xf32>
    tpu.vector_store %arg8[%c0_14, %c0_15], %12 {strides = array<i32>} : memref<16x1xf32, #tpu.memory_space<vmem>>, vector<16x1xf32>,
    %cst_16 = arith.constant dense<0xFF800000> : vector<16xf32>
    %25 = vector.multi_reduction <maximumf>, %8, %cst_16 [0] : vector<16x16xf32> to vector<16xf32>
    %26 = vector.shape_cast %25 : vector<16xf32> to vector<1x16xf32>
    %27 = vector.broadcast %26 : vector<1x16xf32> to vector<16x16xf32>
    %28 = arith.subf %8, %27 : vector<16x16xf32>
    %29 = math.exp %28 : vector<16x16xf32>
    %cst_17 = arith.constant 1.000000e+00 : f32
    %30 = vector.broadcast %cst_17 : f32 to vector<1x16xf32>
    %cst_18 = arith.constant dense<0.000000e+00> : vector<1x16xf32>
    %31 = tpu.matmul %30, %29, %cst_18 {dimension_numbers = #tpu.dot_dimension_numbers<[1], [0], [0], [1], [0, 0, 1, 1], [], []>} : vector<1x16xf32>, vector<16x16xf32>, vector<1x16xf32> -> vector<1x16xf32>
    %32 = vector.shape_cast %26 : vector<1x16xf32> to vector<1x1x1x16xf32>
    %c0_19 = arith.constant 0 : index
    %c0_20 = arith.constant 0 : index
    %c0_21 = arith.constant 0 : index
    %c0_22 = arith.constant 0 : index
    %33 = vector.load %arg6[%c0_19, %c0_20, %c0_21, %c0_22] : memref<1x1x1x16xf32, #tpu.memory_space<vmem>>, vector<1x1x1x16xf32>
    tpu.vector_store %arg6[%c0_19, %c0_20, %c0_21, %c0_22], %32 {strides = array<i32>} : memref<1x1x1x16xf32, #tpu.memory_space<vmem>>, vector<1x1x1x16xf32>,
    %34 = vector.shape_cast %31 : vector<1x16xf32> to vector<1x1x1x16xf32>
    %c0_23 = arith.constant 0 : index
    %c0_24 = arith.constant 0 : index
    %c0_25 = arith.constant 0 : index
    %c0_26 = arith.constant 0 : index
    %35 = vector.load %arg7[%c0_23, %c0_24, %c0_25, %c0_26] : memref<1x1x1x16xf32, #tpu.memory_space<vmem>>, vector<1x1x1x16xf32>
    tpu.vector_store %arg7[%c0_23, %c0_24, %c0_25, %c0_26], %34 {strides = array<i32>} : memref<1x1x1x16xf32, #tpu.memory_space<vmem>>, vector<1x1x1x16xf32>,
    %36 = arith.cmpi eq, %arg0, %arg1 : i32
    %37 = arith.extui %36 : i1 to i32
    %c0_i32_27 = arith.constant 0 : i32
    %38 = arith.cmpi ne, %37, %c0_i32_27 : i32
    scf.if %38 {
      %42 = tpu.iota {dimensions = array<i32: 0>} : vector<16x16xi32>
      %43 = tpu.iota {dimensions = array<i32: 1>} : vector<16x16xi32>
      %44 = arith.cmpi eq, %42, %43 : vector<16x16xi32>
      %cst_29 = arith.constant 0.000000e+00 : f32
      %45 = vector.broadcast %cst_29 : f32 to vector<16x16xf32>
      %46 = arith.select %44, %8, %45 : vector<16x16xi1>, vector<16x16xf32>
      %47 = vector.shape_cast %46 : vector<16x16xf32> to vector<1x16x16xf32>
      %cst_30 = arith.constant dense<0.000000e+00> : vector<1xf32>
      %48 = vector.multi_reduction <add>, %47, %cst_30 [1, 2] : vector<1x16x16xf32> to vector<1xf32>
      %49 = vector.shape_cast %48 : vector<1xf32> to vector<1x1x1xf32>
      %50 = vector.extract %49[0, 0, 0] : f32 from vector<1x1x1xf32>
      %c0_31 = arith.constant 0 : index
      %c0_32 = arith.constant 0 : index
      %51 = memref.load %arg10[%c0_31, %c0_32] : memref<1x1xf32, #tpu.memory_space<smem>>
      %cst_33 = arith.constant -2.000000e+00 : f32
      %52 = arith.mulf %cst_33, %50 : f32
      %53 = arith.addf %51, %52 : f32
      %c0_34 = arith.constant 0 : index
      %c0_35 = arith.constant 0 : index
      %54 = memref.load %arg10[%c0_34, %c0_35] : memref<1x1xf32, #tpu.memory_space<smem>>
      memref.store %53, %arg10[%c0_34, %c0_35] : memref<1x1xf32, #tpu.memory_space<smem>>
    } else {
    }
    %c3_i32 = arith.constant 3 : i32
    %39 = arith.cmpi eq, %arg1, %c3_i32 : i32
    %40 = arith.extui %39 : i1 to i32
    %c0_i32_28 = arith.constant 0 : i32
    %41 = arith.cmpi ne, %40, %c0_i32_28 : i32
    scf.if %41 {
      %c0_29 = arith.constant 0 : index
      %c0_30 = arith.constant 0 : index
      %42 = memref.load %arg10[%c0_29, %c0_30] : memref<1x1xf32, #tpu.memory_space<smem>>
      %c0_31 = arith.constant 0 : index
      %c0_32 = arith.constant 0 : index
      %43 = vector.load %arg8[%c0_31, %c0_32] : memref<16x1xf32, #tpu.memory_space<vmem>>, vector<16x1xf32>
      %c0_33 = arith.constant 0 : index
      %c0_34 = arith.constant 0 : index
      %44 = vector.load %arg9[%c0_33, %c0_34] : memref<16x1xf32, #tpu.memory_space<vmem>>, vector<16x1xf32>
      %45 = math.log %44 : vector<16x1xf32>
      %46 = arith.addf %43, %45 : vector<16x1xf32>
      %47 = vector.shape_cast %46 : vector<16x1xf32> to vector<1x16x1xf32>
      %cst_35 = arith.constant dense<0.000000e+00> : vector<1xf32>
      %48 = vector.multi_reduction <add>, %47, %cst_35 [1, 2] : vector<1x16x1xf32> to vector<1xf32>
      %49 = vector.shape_cast %48 : vector<1xf32> to vector<1x1x1xf32>
      %50 = vector.extract %49[0, 0, 0] : f32 from vector<1x1x1xf32>
      %51 = arith.addf %42, %50 : f32
      %c0_36 = arith.constant 0 : index
      %c0_37 = arith.constant 0 : index
      %52 = memref.load %arg10[%c0_36, %c0_37] : memref<1x1xf32, #tpu.memory_space<smem>>
      memref.store %51, %arg10[%c0_36, %c0_37] : memref<1x1xf32, #tpu.memory_space<smem>>
      %c0_38 = arith.constant 0 : index
      %c0_39 = arith.constant 0 : index
      %53 = memref.load %arg10[%c0_38, %c0_39] : memref<1x1xf32, #tpu.memory_space<smem>>
      %54 = vector.broadcast %53 : f32 to vector<1x1x128xf32>
      %c0_40 = arith.constant 0 : index
      %c0_41 = arith.constant 0 : index
      %c0_42 = arith.constant 0 : index
      %55 = vector.load %arg5[%c0_40, %c0_41, %c0_42] : memref<1x1x128xf32, #tpu.memory_space<vmem>>, vector<1x1x128xf32>
      tpu.vector_store %arg5[%c0_40, %c0_41, %c0_42], %54 {strides = array<i32>} : memref<1x1x128xf32, #tpu.memory_space<vmem>>, vector<1x1x128xf32>,
    } else {
    }
    return
  }
  func.func @transform_0(%arg0: i32, %arg1: i32) -> (i32, i32) {
    %c0_i32 = arith.constant 0 : i32
    %c0_i32_0 = arith.constant 0 : i32
    %c0_i32_1 = arith.constant 0 : i32
    return %c0_i32, %c0_i32_0 : i32, i32
  }
  func.func @transform_1(%arg0: i32, %arg1: i32) -> (i32, i32) {
    %c0_i32 = arith.constant 0 : i32
    %c0_i32_0 = arith.constant 0 : i32
    return %arg0, %c0_i32 : i32, i32
  }
  func.func @transform_2(%arg0: i32, %arg1: i32) -> (i32, i32) {
    %c0_i32 = arith.constant 0 : i32
    %c0_i32_0 = arith.constant 0 : i32
    return %arg1, %c0_i32 : i32, i32
  }
  func.func @transform_3(%arg0: i32, %arg1: i32) -> (i32, i32, i32) {
    %c0_i32 = arith.constant 0 : i32
    %c0_i32_0 = arith.constant 0 : i32
    %c0_i32_1 = arith.constant 0 : i32
    return %arg0, %c0_i32, %c0_i32_0 : i32, i32, i32
  }
  func.func @transform_4(%arg0: i32, %arg1: i32) -> (i32, i32, i32, i32) {
    %c0_i32 = arith.constant 0 : i32
    %c0_i32_0 = arith.constant 0 : i32
    %c0_i32_1 = arith.constant 0 : i32
    return %arg0, %arg1, %c0_i32, %c0_i32_0 : i32, i32, i32, i32
  }
  func.func @transform_5(%arg0: i32, %arg1: i32) -> (i32, i32, i32, i32) {
    %c0_i32 = arith.constant 0 : i32
    %c0_i32_0 = arith.constant 0 : i32
    %c0_i32_1 = arith.constant 0 : i32
    return %arg0, %arg1, %c0_i32, %c0_i32_0 : i32, i32, i32, i32
  }
}

</mosaic_0001>

<bundles_post_ra>
// kernel: tpu_custom_call.1
= control target key start
LH: loop header
LB: loop body
LE: loop exit
PB: predicated region body
PF: predicated region fallthrough
CT: control target
= control target key end

     0   :  { %s1755_s0 = inlined_call_operand.<no memory space> [shape: f32[1,1], index: 0, kind: input, shape index: {}]   ;;  %s1756_s1 = inlined_call_operand.hbm [shape: f32[64,128], index: 1, kind: input, shape index: {}]   ;;  %s1757_s2 = inlined_call_operand.hbm [shape: f32[64,128], index: 2, kind: input, shape index: {}]   ;;  %s1758_s3 = inlined_call_operand.hbm [shape: f32[4,1,128], index: 3, kind: output, shape index: {0}]   ;;  %s1759_s4 = inlined_call_operand.hbm [shape: f32[4,4,1,16], index: 4, kind: output, shape index: {1}]   ;;  %s1760_s5 = inlined_call_operand.hbm [shape: f32[4,4,1,16], index: 5, kind: output, shape index: {2}]  }
   0x1   :  { %1787 = sst [smem:[#allocation31_spill]] %s1756_s1 }
   0x2   :  { %1788 = sst [smem:[#allocation32_spill]] %s1757_s2 }
   0x3   :  { %1789 = sst [smem:[#allocation33_spill]] %s1758_s3 }
   0x4   :  { %1790 = sst [smem:[#allocation34_spill]] %s1759_s4 }
   0x5   :  { %1791 = sst [smem:[#allocation35_spill]] %s1760_s5 }
   0x6   :  { %11 = sst [smem:[#allocation5]] %s1755_s0 }
   0x7   :  { %12 = vsyncpa [#allocation7], 0 }
   0x8   :  { %14 = vsyncpa [#allocation7 + $0x1], 0 }
   0x9   :  { %15 = vsyncpa [#allocation10], 0 }
   0xa   :  { %17 = vsyncpa [#allocation10 + $0x1], 0 }
   0xb   :  { %18 = vsyncpa [#allocation8], 0 }
   0xc   :  { %20 = vsyncpa [#allocation8 + $0x1], 0 }
   0xd   :  { %21 = vsyncpa [#allocation13], 0 }
   0xe   :  { %23 = vsyncpa [#allocation13 + $0x1], 0  ;;  %s1349_s20 = smov 0   ;;  %s1351_s21 = smov 0  }
   0xf   :  { %s1353_s22 = smov 0   ;;  %s1355_s23 = smov 0  }
  0x10   :  { %s1357_s24 = smov 0   ;;  %s1359_s25 = smov 0  }
  0x11   :  { %s1361_s0 = smov 0   ;;  %s1363_s26 = smov 0  }
  0x12   :  { %s1365_s27 = smov 0   ;;  %s1367_s28 = smov 0  }
  0x13   :  { %s1369_s29 = smov 0   ;;  %s1371_s30 = smov 0  }
  0x14   :  { %s1373_s6 = smov 0   ;;  %s1375_s7 = smov 0  }
  0x15 LB: > { %1792 = sst [smem:[#allocation19_spill]] %s1268_s25  ;;  %s1420_s8 = sadd.s32 4294967295, %s1300_s7   ;;  %s1300_s7 = sphi %s1375_s7, %s29_s7   ;;  %s1296_s6 = sphi %s1373_s6, %s1849_s6   ;;  %s1292_s30 = sphi %s1371_s30, %s1848_s30   ;;  %s1288_s29 = sphi %s1369_s29, %s1847_s29   ;;  %s1284_s28 = sphi %s1367_s28, %s1846_s28   ;;  %s1280_s27 = sphi %s1365_s27, %s1845_s27   ;;  %s1276_s26 = sphi %s1363_s26, %s1844_s26   ;;  %s1272_s0 = sphi %s1361_s0, %s1843_s0   ;;  %s1268_s25 = sphi %s1359_s25, %s1842_s25   ;;  %s1264_s24 = sphi %s1357_s24, %s1854_s24   ;;  %s1260_s23 = sphi %s1355_s23, %s1853_s23   ;;  %s1256_s22 = sphi %s1353_s22, %s1852_s22   ;;  %s1252_s21 = sphi %s1351_s21, %s1851_s21   ;;  %s1248_s20 = sphi %s1349_s20, %s1850_s20  }
  0x16   : > { %1793 = sst [smem:[#allocation20_spill]] %s1272_s0  ;;  %s1761_s9 = sadd.s32 4294967294, %s1300_s7  }
  0x17   : > { %1794 = sst [smem:[#allocation21_spill]] %s1276_s26  ;;  %p76_p0 = scmp.ne.s32.totalorder %s1280_s27, %s1276_s26 }
  0x18   : > { %1795 = sst [smem:[#allocation22_spill]] %s1280_s27  ;;  %p1769_p1 = scmp.eq.s32.totalorder %s1300_s7, 0 }
  0x19   : > { %1796 = sst [smem:[#allocation23_spill]] %s1292_s30  ;;  %p82_p2 = scmp.ne.s32.totalorder %s1276_s26, %s1272_s0 }
  0x1a   : > { %1797 = sst [smem:[#allocation24_spill]] %s1296_s6  ;;  %p1771_p3 = scmp.eq.s32.totalorder %s1420_s8, 0 }
  0x1b   : > { %p1432_p4 = por %p1769_p1, %p76_p0  ;;  %p1770_p5 = scmp.eq.s32.totalorder %s1420_s8, 15 }
  0x1c   : > { %p1439_p6 = por %p1771_p3, %p82_p2  ;;  %p1445_p7 = scmp.eq.s32.totalorder %s1761_s9, 15 }
  0x1d   : > { %p1451_p8 = por %p1770_p5, %p76_p0  ;;  %p1772_p10 = scmp.lt.s32.totalorder %s1300_s7, 16 }
  0x1e   : > { %p1457_p9 = por %p1445_p7, %p82_p2  ;;  %s217_s16 = sand.u32 1, %s1280_s27  }
  0x1f   : > { %s1801_s14 = scalar_select %p1451_p8, 1, 0 }
  0x20   : > { %s1803_s15 = scalar_select %p1457_p9, 1, 0 }
  0x21   : > { %1802 = sst [smem:[#allocation25_spill]] %s1801_s14  ;;  %s845_s17 = sshll.u32 %s1296_s6, 8 }
  0x22   : > { %1804 = sst [smem:[#allocation26_spill]] %s1803_s15  ;;  %s825_s18 = sshll.u32 %s217_s16, 4 }
  0x23   : > { %s1805_s1 = sld [smem:[#allocation31_spill]]  ;;  %s221_s0 = scalar_lea.vmem [#allocation6], %s825_s18 }
  0x24   : > { %s228_s5 = sshll.u32 %s221_s0, 4  ;;  %p1471_p11 = pnand %p1772_p10, %p1432_p4  ;;  %s229_s5 = int_to_ptr.vmem [resolvable:$true] %s228_s5 }
  0x25   : > { %s218_s14 = scalar_lea.sflag [#allocation7], %s217_s16  ;;  %s1053_s15 = scalar_lea.vmem %s229_s5, 256 }
  0x26   : > { %p1042_p12 = pneg %p1471_p11  ;;  %p1054_p13 = scmp.ne.s32.totalorder %s229_s5, %s1053_s15 }
  0x27   : > { %s1302_s4 = smov [#allocation6]  }
  0x28   : > { %p1056_p0 = pnand %p1054_p13, %p1042_p12  ;;  %s1058_s9 = sshll.u32 %s1302_s4, 4  ;;  %s1059_s9 = int_to_ptr.vmem [resolvable:$false] %s1058_s9 }
  0x29   : > { %s227_s10 = scalar_lea.hbm %s1805_s1, %s845_s17  ;;  %s1060_s17 = scalar_lea.vmem %s1059_s9, 512 }
  0x2a   : > { %p1057_p2 = pneg %p1056_p0  ;;  %p1061_p1 = scmp.lt.s32.totalorder %s229_s5, %s1059_s9 }
  0x2b   : > { %p1062_p5 = scmp.lt.s32.totalorder %s1060_s17, %s1053_s15 }
  0x2d   : > { %p1063_p3 = por %p1062_p5, %p1061_p1 }
  0x2f   : > { %p1064_p4 = pnand %p1063_p3, %p1057_p2 }
  0x31   : > { %1067 = shalt.err (!%p1064_p4)
}
  0x32   : > { %s1773_s0 = smov 128   ;;  %s1774_s4 = smov 8  }
  0x33   : > { %885 = dma.hbm_to_vmem [thread:$0]  (!%p1471_p11), %s227_s10, 256, %s229_s5, %s218_s14, %s1773_s0, %s1773_s0, %s1774_s4  }
  0x34   : > { %p831_p1 = scmp.ge.s32.totalorder %s1300_s7, 1  ;;  %p257_p3 = scmp.lt.s32.totalorder %s1300_s7, 17 }
  0x35   : > { %s69_s11 = sadd.s32 1, %s1280_s27  ;;  %s38_s16 = sadd.s32 1, %s1292_s30 }
  0x36   : > { %p1485_p5 = pnand %p831_p1, %p257_p3  ;;  %p39_p12 = scmp.ge.s32.totalorder %s38_s16, 4 }
  0x37   : > { %s95_s3 = sadd.s32 1, %s1268_s25  ;;  %p108_p13 = scmp.ne.s32.totalorder %s1264_s24, %s1260_s23 }
  0x38   : > { %s1856_s16 = smov (%p39_p12, %s38_s16), 0  ;;  %s1809_s5 = sadd.s32 1, %s1296_s6 }
  0x39   : > { %1808 = sst [smem:[#allocation27_spill]] %s1856_s16  ;;  %s1858_s5 = smov (!%p39_p12, %s1809_s5), %s1296_s6 }
  0x3a   : > { %s92_s10 = ssub.s32 %s1292_s30, %s1856_s16  ;;  %p43_p0 = scmp.ge.s32.totalorder %s1858_s5, 4 }
  0x3b   : > { %p93_p2 = scmp.eq.s32.totalorder %s92_s10, 0  ;;  %p1810_p4 = scmp.eq.s32.totalorder %s1420_s8, 0 }
  0x3c   : > { %s149_s14 = sadd.s32 1, %s1256_s22  ;;  %s1860_s5 = smov (%p43_p0, %s1858_s5), 0 }
  0x3d   : > { %p1504_p1 = por %p108_p13, %p1810_p4  ;;  %1812 = sst [smem:[#allocation28_spill]] %s1860_s5 }
  0x3e   : > { %s1512_s18 = scalar_select %p93_p2, %s1268_s25, %s95_s3  }
  0x3f   : > { %s66_s19 = ssub.s32 %s1296_s6, %s1860_s5  ;;  %p159_p3 = scmp.ne.s32.totalorder %s1256_s22, %s1252_s21 }
  0x40   : > { %1813 = sst [smem:[#allocation29_spill]] %s1512_s18  ;;  %p67_p12 = scmp.eq.s32.totalorder %s66_s19, 0 }
  0x41   : > { %s146_s9 = sor.u32 %s92_s10, %s66_s19  ;;  %p1814_p11 = scmp.eq.s32.totalorder %s1420_s8, 15 }
  0x42   : > { %p147_p10 = scmp.eq.s32.totalorder %s146_s9, 0  ;;  %p165_p13 = scmp.ne.s32.totalorder %s1252_s21, %s1248_s20 }
  0x43   : > { %p1520_p9 = por %p159_p3, %p1814_p11  ;;  %s238_s1 = sand.u32 1, %s1268_s25  }
  0x44   : > { %s1525_s0 = scalar_select %p67_p12, %s1280_s27, %s69_s11  }
  0x45   : > { %s1815_s17 = scalar_select %p1520_p9, 1, 0 }
  0x46   : > { %1816 = sst [smem:[#allocation30_spill]] %s1525_s0  ;;  %p1817_p0 = scmp.eq.s32.totalorder %s1300_s7, 0 }
  0x47   : > { %s1528_s4 = scalar_select %p147_p10, %s1256_s22, %s149_s14  }
  0x48   : > { %p1818_p2 = scmp.ne.s32.totalorder %s1268_s25, %s1264_s24  ;;  %s828_s3 = sshll.u32 %s238_s1, 4 }
  0x49   : > { %p1540_p8 = por %p165_p13, %p1445_p7  ;;  %s846_s10 = sshll.u32 %s1292_s30, 8 }
  0x4a   : > { %p104_p4 = por %p1818_p2, %p1817_p0  ;;  %s242_s19 = scalar_lea.vmem [#allocation9], %s828_s3 }
  0x4b   : > { %s1819_s5 = scalar_select %p1540_p8, 1, 0 }
  0x4c   : > { %s249_s9 = sshll.u32 %s242_s19, 4  ;;  %s1820_s2 = sld [smem:[#allocation32_spill]]  ;;  %s250_s9 = int_to_ptr.vmem [resolvable:$true] %s249_s9 }
  0x4d   : > { %p1821_p10 = scmp.lt.s32.totalorder %s1300_s7, 16  ;;  %s239_s14 = scalar_lea.sflag [#allocation10], %s238_s1 }
  0x4e   : > { %s1081_s13 = scalar_lea.vmem %s250_s9, 256  ;;  %s1305_s3 = smov [#allocation9]  }
  0x4f   : > { %p1550_p11 = pnand %p1821_p10, %p104_p4  ;;  %p1082_p3 = scmp.ne.s32.totalorder %s250_s9, %s1081_s13 }
  0x50   : > { %s1086_s19 = sshll.u32 %s1305_s3, 4  ;;  %s1087_s19 = int_to_ptr.vmem [resolvable:$false] %s1086_s19 }
  0x51   : > { %p1070_p7 = pneg %p1550_p11  ;;  %s1088_s30 = scalar_lea.vmem %s1087_s19, 512 }
  0x52   : > { %s248_s11 = scalar_lea.hbm %s1820_s2, %s846_s10  ;;  %p1089_p0 = scmp.lt.s32.totalorder %s250_s9, %s1087_s19 }
  0x53   : > { %p1084_p12 = pnand %p1082_p3, %p1070_p7  ;;  %p1090_p2 = scmp.lt.s32.totalorder %s1088_s30, %s1081_s13 }
  0x55   : > { %p1085_p13 = pneg %p1084_p12  ;;  %p1091_p8 = por %p1090_p2, %p1089_p0 }
  0x57   : > { %p1092_p9 = pnand %p1091_p8, %p1085_p13 }
  0x59   : > { %1095 = shalt.err (!%p1092_p9)
}
  0x5a   : > { %s1823_s6 = smov 8   ;;  %s1824_s16 = smov 128  }
  0x5b   : > { %888 = dma.hbm_to_vmem [thread:$0]  (!%p1550_p11), %s248_s11, 256, %s250_s9, %s239_s14, %s1824_s16, %s1824_s16, %s1823_s6  }
  0x5c   : > { %261 = sbr.rel (%p1485_p5) target bundleno = 1277 (0x4fd), region = 32  ;;  %s1564_s1 = sand.u32 (!%p1485_p5), 1, %s1276_s26  }
  0x5d   : > { %s832_s10 = sshll.u32 (!%p1485_p5), %s1564_s1, 4  ;;  %s264_s30 = scalar_lea.sflag (!%p1485_p5), [#allocation7], %s1564_s1 }
  0x5e   : > { %s1568_s13 = scalar_lea.vmem (!%p1485_p5), [#allocation6], %s832_s10 }
  0x61   : > { %1231 = dma.done.wait (%p1439_p6), %s264_s30, 256  }
  0x62   : > { %1233 = vsyncadd (%p1439_p6), %s264_s30, 4294967040  ;;  %s272_s9 = sand.u32 1, %s1264_s24  }
  0x63   : > { %s833_s15 = sshll.u32 %s272_s9, 4  ;;  %s273_s11 = scalar_lea.sflag [#allocation10], %s272_s9 }
  0x64   : > { %s276_s20 = scalar_lea.vmem [#allocation9], %s833_s15 }
  0x65   : > { %1235 = dma.done.wait (%p1504_p1), %s273_s11, 256  }
  0x66   : > { %1237 = vsyncadd (%p1504_p1), %s273_s11, 4294967040  ;;  %s307_s14 = sand.u32 1, %s1252_s21   ;;  %s1782_s3 = scalar_lea.vmem [#allocation11], %s1564_s1 }
  0x67   : > { %s1581_s19 = scalar_lea.vmem [#allocation12], %s307_s14  ;;  %s1583_s6 = scalar_lea.vmem [#allocation14], %s307_s14 }
  0x68   : > { %p834_p6 = scmp.ne.s32.totalorder %s1284_s28, 0 }
  0x69   : > { %s1306_s12 = smov (!%p834_p6), 0.0  }
  0x6a   : > { %320 = sbr.rel (%p834_p6) target bundleno = 114 (0x72), region = 44  ;;  %322 = sst [smem:[#allocation4]] (!%p834_p6), %s1306_s12 }
  0x6f   : > { %vm323_vm0 = vcmask 7168   ;;  %v1307_v0 = vmov -inf   ;;  %v1308_v1 = vmov 0.0  }
  0x70   : > { %324 = vst.msk [vmem:[#allocation2] sm:$0xff] %vm323_vm0, %v1307_v0  ;;  %325 = vst.msk [vmem:[#allocation2 + $0x8] sm:$0xff] %vm323_vm0, %v1307_v0 }
  0x71   : > { %326 = vst.msk [vmem:[#allocation3] sm:$0xff] %vm323_vm0, %v1308_v1  ;;  %327 = vst.msk [vmem:[#allocation3 + $0x8] sm:$0xff] %vm323_vm0, %v1308_v1 }
  0x72 PF: > { %v332_v2 = vld [vmem:[%s276_s20 + $0x8] sm:$0xff]  ;;  %v331_v3 = vld [vmem:[%s276_s20] sm:$0xff]  ;;  %v1309_v6 = vmov 0.0   ;;  %s328_s23 = sld [smem:[#allocation5]]  ;;  %vm413_vm1 = vcmask 130048   ;;  %vm547_vm2 = vcmask 122880   ;;  %p836_p8 = scmp.ne.s32.totalorder %s1288_s29, %s1284_s28 }
  0x73   : > { %v329_v4 = vld [vmem:[%s1568_s13] sm:$0xff]  ;;  %854 = vmatprep.subr.mxu0 %v332_v2  ;;  %v330_v5 = vld [vmem:[%s1568_s13 + $0x8] sm:$0xff]  ;;  %861 = vmatprep.subr.mxu1 %v1309_v6  ;;  %v1310_v21 = vmov 0   ;;  %vm1311_vm3 = vmmov 0   ;;  %v1312_v28 = vmov 1.0   ;;  %vm456_vm4 = vcmask 7168  }
  0x74   : > { %858 = vmatprep.mubr.f32.mxu0 %v329_v4  ;;  %855 = vmatpush3.xpose.msra.mxu0 %v332_v2  ;;  %s575_s16 = sld [smem:[#allocation4]] (!%p836_p8) }
  0x75   : > { %856 = vmatprep.subr.mxu0 %v331_v3  ;;  %1022 = vset.pattern.permute.xlu1 %v1310_v21 }
  0x76   : > { %1023 = vset.pattern.permute.xlu0 %v1310_v21  ;;  %865 = vmatprep.mubr.msk.f32.mxu1 %vm1311_vm3, %v1309_v6 }
  0x77   : > { %v411_v29 = vld [vmem:[#allocation2] sm:$0xff]  ;;  %v412_v32 = vld [vmem:[#allocation2 + $0x8] sm:$0xff] }
  0x78   : > { %857 = vmatpush3.xpose.msra.mxu0 %v331_v3  ;;  %v408_v7 = vstv %s328_s23  ;;  %v438_v52 = vld [vmem:[#allocation3] sm:$0xff]  ;;  %v439_v56 = vld [vmem:[#allocation3 + $0x8] sm:$0xff] }
  0x7b   : > { %859 = vmatmul.mubr.f32.vlgmr.msra.gmra.mxu0 %v330_v5 }
 0x13b   : > { %v860_v8 = vpop.f32.mrf.mxu0 }
 0x13c   : > { %v1588_v9 = vmul.f32 %v860_v8, %v408_v7 }
 0x13d   : > { %v399_v10 = vpop.f32.mrf.mxu0 }
 0x13e   : > { %v1590_v11 = vmul.f32 %v408_v7, %v399_v10  ;;  %v417_v13 = vsel %vm413_vm1, %v1588_v9, -inf }
 0x140   : > { %v414_v12 = vsel %vm413_vm1, %v1590_v11, -inf }
 0x141   : > { %415 = vmax.xlane.f32.xlu0 %v414_v12  ;;  %v461_v14 = vmax.f32 %v414_v12, %v417_v13 }
 0x143   : > { %v462_v15 = vrot.slane %v461_v14, 4 }
 0x145   : > { %418 = vmax.xlane.f32.xlu0 %v417_v13  ;;  %v463_v16 = vmax.f32 %v461_v14, %v462_v15 }
 0x147   : > { %v464_v17 = vrot.slane %v463_v16, 2 }
 0x149   : > { %v465_v18 = vmax.f32 %v463_v16, %v464_v17 }
 0x14b   : > { %v466_v19 = vrot.slane %v465_v18, 1 }
 0x14d   : > { %v467_v20 = vmax.f32 %v465_v18, %v466_v19 }
 0x14f   : > { %v468_v22 = vsub.f32 %v1590_v11, %v467_v20  ;;  %v469_v23 = vsub.f32 %v1588_v9, %v467_v20  ;;  %548 = vst.msk [vmem:[%s1581_s19] sm:$0x1] %vm547_vm2, %v467_v20 }
 0x151   : > { %v472_v24 = vmul.f32 1.442695, %v469_v23  ;;  %v470_v25 = vmul.f32 1.442695, %v468_v22 }
 0x153   : > { %1024 = vpow2.f32 %v472_v24 }
 0x154   : > { %1026 = vpow2.f32 %v470_v25 }
 0x160   : > { %v1025_v26 = vpop.eup %1024 }
 0x161   : > { %862 = vmatpush3.msra.mxu1 %v1025_v26  ;;  %v1027_v27 = vpop.eup %1026 }
 0x162   : > { %863 = vmatprep.subr.mxu1 %v1309_v6 }
 0x163   : > { %864 = vmatpush3.msra.mxu1 %v1027_v27 }
 0x164   : > { %866 = vmatmul.mubr.msk.f32.vlgmr.msra.gmra.mxu1 %vm413_vm1, %v1312_v28 }
 0x1ca   : > { %v416_v30 = vpop.xlane.xlu0 %415 }
 0x1cb   : > { %v420_v31 = vmax.f32 %v411_v29, %v416_v30 }
 0x1cd   : > { %v440_v33 = vsub.f32 %v411_v29, %v420_v31  ;;  %459 = vst.msk [vmem:[#allocation2] sm:$0xff] %vm456_vm4, %v420_v31  ;;  %424 = vperm.xlu1 %1022, %v420_v31  }
 0x1ce   : > { %v419_v34 = vpop.xlane.xlu0 %418 }
 0x1cf   : > { %v421_v35 = vmax.f32 %v412_v32, %v419_v34  ;;  %v442_v49 = vmul.f32 1.442695, %v440_v33 }
 0x1d1   : > { %v441_v36 = vsub.f32 %v412_v32, %v421_v35  ;;  %460 = vst.msk [vmem:[#allocation2 + $0x8] sm:$0xff] %vm456_vm4, %v421_v35  ;;  %429 = vperm.xlu1 %1022, %v421_v35  }
 0x1d3   : > { %v444_v50 = vmul.f32 1.442695, %v441_v36 }
 0x224   : > { %v543_v47 = vpop.f32.mrf.mxu1 }
 0x225   : > { %549 = vst.msk [vmem:[%s1583_s6] sm:$0x1] %vm547_vm2, %v543_v47 }
 0x226   : > { %v867_v48 = vpop.f32.mrf.mxu1 }
 0x248   : > { %v425_v37 = vpop.permute.xlu1 %424 }
 0x249   : > { %v432_v38 = vsub.f32 %v1590_v11, %v425_v37 }
 0x24b   : > { %v434_v39 = vmul.f32 1.442695, %v432_v38 }
 0x24c   : > { %v430_v40 = vpop.permute.xlu1 %429 }
 0x24d   : > { %1028 = vpow2.f32 %v434_v39  ;;  %v433_v41 = vsub.f32 %v1588_v9, %v430_v40 }
 0x24f   : > { %v436_v42 = vmul.f32 1.442695, %v433_v41 }
 0x251   : > { %1030 = vpow2.f32 %v436_v42 }
 0x252   : > { %1032 = vpow2.f32 %v442_v49 }
 0x253   : > { %1034 = vpow2.f32 %v444_v50 }
 0x25a   : > { %v1029_v43 = vpop.eup %1028 }
 0x25b   : > { %v448_v44 = vsel %vm413_vm1, %v1029_v43, 0.0 }
 0x25c   : > { %449 = vadd.xlane.f32.xlu0 %v448_v44 }
 0x25e   : > { %v1031_v45 = vpop.eup %1030 }
 0x25f   : > { %v451_v46 = vsel %vm413_vm1, %v1031_v45, 0.0  ;;  %v1033_v51 = vpop.eup %1032 }
 0x260   : > { %452 = vadd.xlane.f32.xlu1 %v451_v46  ;;  %v446_v53 = vmul.f32 %v1033_v51, %v438_v52  ;;  %v1035_v54 = vpop.eup %1034 }
 0x261   : > { %v447_v58 = vmul.f32 %v1035_v54, %v439_v56 }
 0x2e5   : > { %v450_v55 = vpop.xlane.xlu0 %449 }
 0x2e6   : > { %v454_v57 = vadd.f32 %v450_v55, %v446_v53 }
 0x2e8   : > { %457 = vst.msk [vmem:[#allocation3] sm:$0xff] %vm456_vm4, %v454_v57  ;;  %553 = sbr.rel (%p836_p8) target bundleno = 965 (0x3c5), region = 48 }
 0x2e9   : > { %v453_v59 = vpop.xlane.xlu1 %452 }
 0x2ea   : > { %v455_v60 = vadd.f32 %v453_v59, %v447_v58 }
 0x2ec   : > { %458 = vst.msk [vmem:[#allocation3 + $0x8] sm:$0xff] %vm456_vm4, %v455_v60 }
 0x2ed   : > { %v554_v61 = vlaneseq }
 0x2ef   : > { %v555_v62 = vshrl.u32 %v554_v61, 7  ;;  %v558_v63 = vand.u32 127, %v554_v61 }
 0x2f1   : > { %v556_v0 = vadd.s32 8, %v555_v62  ;;  %vm559_vm5 = vcmp.eq.s32.totalorder %v555_v62, %v558_v63 }
 0x2f2   : > { %v561_v1 = vsel %vm559_vm5, %v1590_v11, 0.0 }
 0x2f3   : > { %vm560_vm6 = vcmp.eq.s32.totalorder %v556_v0, %v558_v63  ;;  %v563_v2 = vsel %vm413_vm1, %v561_v1, 0.0 }
 0x2f4   : > { %v562_v3 = vsel %vm560_vm6, %v1588_v9, 0.0 }
 0x2f5   : > { %v564_v4 = vsel %vm413_vm1, %v562_v3, 0.0 }
 0x2f6   : > { %v565_v5 = vadd.f32 %v564_v4, %v563_v2 }
 0x2f8   : > { %566 = vadd.xlane.f32.xlu0 %v565_v5 }
 0x381   : > { %v567_v6 = vpop.xlane.xlu0 %566 }
 0x382   : > { %v568_v7 = vrot.slane %v567_v6, 4 }
 0x384   : > { %v569_v8 = vadd.f32 %v568_v7, %v567_v6 }
 0x386   : > { %v570_v10 = vrot.slane %v569_v8, 2 }
 0x388   : > { %v571_v12 = vadd.f32 %v570_v10, %v569_v8 }
 0x38a   : > { %v572_v13 = vrot.slane %v571_v12, 1 }
 0x38c   : > { %v573_v14 = vadd.f32 %v572_v13, %v571_v12 }
 0x38e   : > { %868 = vpush %v573_v14 }
 0x3bf   : > { %s869_s10 = spop %868 }
 0x3c0   : > { %s576_s30 = smul.f32 -2.0, %s869_s10 }
 0x3c2   : > { %s577_s13 = sadd.f32 %s576_s30, %s575_s16 }
 0x3c4   : > { %579 = sst [smem:[#allocation4]] %s577_s13 }
 0x3c5 PF: > { %p837_p9 = scmp.ne.s32.totalorder %s1284_s28, 3 }
 0x3c6   : > { %s584_s9 = sld [smem:[#allocation4]] (!%p837_p9) }
 0x3c7   : > { %583 = sbr.rel (%p837_p9) target bundleno = 1199 (0x4af), region = 52 }
 0x3cc   : > { %v587_v9 = vld [vmem:[#allocation3] sm:$0xff]  ;;  %v588_v11 = vld [vmem:[#allocation3 + $0x8] sm:$0xff]  ;;  %v585_v16 = vld [vmem:[#allocation2] sm:$0xff] }
 0x3cd   : > { %1036 = vlog2.f32 %v587_v9  ;;  %v586_v18 = vld [vmem:[#allocation2 + $0x8] sm:$0xff] }
 0x3ce   : > { %1038 = vlog2.f32 %v588_v11 }
 0x3da   : > { %v1037_v15 = vpop.eup %1036 }
 0x3db   : > { %v1039_v17 = vpop.eup %1038  ;;  %v590_v19 = vmul.f32 0.6931472, %v1037_v15 }
 0x3dc   : > { %v592_v20 = vmul.f32 0.6931472, %v1039_v17 }
 0x3dd   : > { %v593_v21 = vadd.f32 %v590_v19, %v585_v16 }
 0x3de   : > { %v594_v22 = vadd.f32 %v592_v20, %v586_v18 }
 0x3df   : > { %v595_v23 = vsel %vm456_vm4, %v593_v21, 0.0 }
 0x3e0   : > { %v596_v24 = vsel %vm456_vm4, %v594_v22, 0.0 }
 0x3e1   : > { %v597_v25 = vadd.f32 %v596_v24, %v595_v23 }
 0x3e3   : > { %598 = vadd.xlane.f32.xlu0 %v597_v25 }
 0x46c   : > { %v599_v26 = vpop.xlane.xlu0 %598 }
 0x46d   : > { %v600_v27 = vrot.slane %v599_v26, 4 }
 0x46f   : > { %v601_v28 = vadd.f32 %v600_v27, %v599_v26 }
 0x471   : > { %v602_v29 = vrot.slane %v601_v28, 2 }
 0x473   : > { %v603_v30 = vadd.f32 %v602_v29, %v601_v28 }
 0x475   : > { %v604_v31 = vrot.slane %v603_v30, 1 }
 0x477   : > { %v605_v32 = vadd.f32 %v604_v31, %v603_v30 }
 0x479   : > { %870 = vpush %v605_v32 }
 0x4aa   : > { %s871_s15 = spop %870 }
 0x4ab   : > { %s607_s11 = sadd.f32 %s871_s15, %s584_s9 }
 0x4ad   : > { %609 = sst [smem:[#allocation4]] %s607_s11  ;;  %v611_v33 = vstv %s607_s11 }
 0x4ae   : > { %612 = vst [vmem:[%s1782_s3] sm:$0x1] %v611_v33 }
 0x4af PF: > { %s617_s20 = sand.u32 1, %s1420_s8   ;;  %s839_s14 = sshll.u32 %s1288_s29, 2 }
 0x4b0   : > { %s1625_s12 = sadd.s32 %s1284_s28, %s839_s14  ;;  %s649_s16 = sshll.u32 %s1581_s19, 4  ;;  %s650_s16 = int_to_ptr.vmem [resolvable:$true] %s649_s16 }
 0x4b1   : > { %s1781_s23 = sshll.u32 %s1625_s12, 4  ;;  %s1825_s13 = sld [smem:[#allocation34_spill]] }
 0x4b2   : > { %s1634_s15 = scalar_lea.sflag [#allocation13], %s617_s20  ;;  %s1096_s11 = scalar_lea.vmem %s650_s16, 16 }
 0x4b3   : > { %p1097_p5 = scmp.ne.s32.totalorder %s650_s16, %s1096_s11  ;;  %p1826_p1 = scmp.ne.s32.totalorder %s1815_s17, 0 }
 0x4b4   : > { %s1313_s8 = smov [#allocation12]  }
 0x4b5   : > { %p1098_p4 = pnand %p1097_p5, %p1826_p1  ;;  %s1100_s28 = sshll.u32 %s1313_s8, 4  ;;  %s1101_s28 = int_to_ptr.vmem [resolvable:$false] %s1100_s28 }
 0x4b6   : > { %s1102_s14 = scalar_lea.vmem %s1101_s28, 32  ;;  %p1103_p11 = scmp.lt.s32.totalorder %s650_s16, %s1101_s28 }
 0x4b7   : > { %s647_s9 = scalar_lea.hbm %s1825_s13, %s1781_s23  ;;  %p1099_p10 = pneg %p1098_p4 }
 0x4b8   : > { %p1104_p7 = scmp.lt.s32.totalorder %s1102_s14, %s1096_s11 }
 0x4ba   : > { %p1105_p3 = por %p1104_p7, %p1103_p11 }
 0x4bc   : > { %p1106_p12 = pnand %p1105_p3, %p1099_p10 }
 0x4be   : > { %1109 = shalt.err (!%p1106_p12)
}
 0x4bf   : > { %s1110_s19 = scalar_lea.hbm %s647_s9, 16  ;;  %s1114_s30 = scalar_lea.hbm %s1825_s13, 256 }
 0x4c0   : > { %p1111_p13 = scmp.ne.s32.totalorder %s647_s9, %s1110_s19  ;;  %p1115_p6 = scmp.lt.s32.totalorder %s647_s9, %s1825_s13 }
 0x4c1   : > { %p1116_p8 = scmp.lt.s32.totalorder %s1114_s30, %s1110_s19 }
 0x4c2   : > { %p1112_p0 = pnand %p1111_p13, %p1826_p1 }
 0x4c3   : > { %p1117_p9 = por %p1116_p8, %p1115_p6 }
 0x4c4   : > { %p1113_p2 = pneg %p1112_p0 }
 0x4c6   : > { %p1118_p5 = pnand %p1117_p9, %p1113_p2 }
 0x4c8   : > { %1121 = shalt.err (!%p1118_p5)
}
 0x4c9   : > { %s1827_s11 = sld [smem:[#allocation25_spill]]  ;;  %s838_s8 = sshll.u32 %s1288_s29, 4 }
 0x4ca   : > { %877 = dma.vmem_to_hbm [thread:$0]  (%p1826_p1), %s650_s16, 16, %s647_s9, %s1634_s15  }
 0x4cb   : > { %s1828_s20 = sld [smem:[#allocation33_spill]]  ;;  %s1830_s3 = scalar_lea.vmem [#allocation11], %s1564_s1 }
 0x4cc   : > { %s634_s23 = sshll.u32 %s1830_s3, 4  ;;  %s1831_s19 = sshll.u32 %s1625_s12, 4  ;;  %s635_s23 = int_to_ptr.vmem [resolvable:$true] %s634_s23 }
 0x4cd   : > { %s1832_s0 = sld [smem:[#allocation35_spill]]  ;;  %s614_s26 = scalar_lea.sflag [#allocation8], %s1564_s1 }
 0x4ce   : > { %s1122_s25 = scalar_lea.vmem %s635_s23, 16  ;;  %s1314_s29 = smov [#allocation11]  }
 0x4cf   : > { %p1123_p4 = scmp.ne.s32.totalorder %s635_s23, %s1122_s25  ;;  %p1834_p10 = scmp.ne.s32.totalorder %s1827_s11, 0 }
 0x4d0   : > { %s1126_s16 = sshll.u32 %s1314_s29, 4  ;;  %s1127_s16 = int_to_ptr.vmem [resolvable:$false] %s1126_s16 }
 0x4d1   : > { %s1829_s10 = smov %s1828_s20  ;;  %s1653_s2 = scalar_lea.hbm %s1828_s20, %s838_s8 }
 0x4d2   : > { %p1124_p11 = pnand %p1123_p4, %p1834_p10  ;;  %s1128_s9 = scalar_lea.vmem %s1127_s16, 32 }
 0x4d3   : > { %s1833_s18 = smov %s1832_s0  ;;  %s1662_s27 = scalar_lea.hbm %s1832_s0, %s1831_s19 }
 0x4d4   : > { %p1125_p7 = pneg %p1124_p11  ;;  %p1129_p3 = scmp.lt.s32.totalorder %s635_s23, %s1127_s16 }
 0x4d5   : > { %p1130_p12 = scmp.lt.s32.totalorder %s1128_s9, %s1122_s25 }
 0x4d7   : > { %p1131_p13 = por %p1130_p12, %p1129_p3 }
 0x4d9   : > { %p1132_p0 = pnand %p1131_p13, %p1125_p7 }
 0x4db   : > { %1135 = shalt.err (!%p1132_p0)
}
 0x4dc   : > { %s1136_s0 = scalar_lea.hbm %s1653_s2, 16  ;;  %s1140_s13 = scalar_lea.hbm %s1829_s10, 64 }
 0x4dd   : > { %p1137_p2 = scmp.ne.s32.totalorder %s1653_s2, %s1136_s0  ;;  %p1141_p9 = scmp.lt.s32.totalorder %s1653_s2, %s1829_s10 }
 0x4de   : > { %p1142_p5 = scmp.lt.s32.totalorder %s1140_s13, %s1136_s0 }
 0x4df   : > { %p1138_p6 = pnand %p1137_p2, %p1834_p10 }
 0x4e0   : > { %p1143_p4 = por %p1142_p5, %p1141_p9 }
 0x4e1   : > { %p1139_p8 = pneg %p1138_p6 }
 0x4e3   : > { %p1144_p11 = pnand %p1143_p4, %p1139_p8 }
 0x4e5   : > { %1147 = shalt.err (!%p1144_p11)
}
 0x4e6   : > { %876 = dma.vmem_to_hbm [thread:$0]  (%p1834_p10), %s635_s23, 16, %s1653_s2, %s614_s26  }
 0x4e7   : > { %s664_s25 = sshll.u32 %s1583_s6, 4  ;;  %s1315_s20 = smov [#allocation14]   ;;  %s665_s25 = int_to_ptr.vmem [resolvable:$true] %s664_s25 }
 0x4e8   : > { %s1148_s14 = scalar_lea.vmem %s665_s25, 16  ;;  %s1152_s3 = sshll.u32 %s1315_s20, 4  ;;  %s1153_s3 = int_to_ptr.vmem [resolvable:$false] %s1152_s3 }
 0x4e9   : > { %p1149_p7 = scmp.ne.s32.totalorder %s665_s25, %s1148_s14  ;;  %s1154_s19 = scalar_lea.vmem %s1153_s3, 32 }
 0x4ea   : > { %p1155_p13 = scmp.lt.s32.totalorder %s665_s25, %s1153_s3  ;;  %p1156_p0 = scmp.lt.s32.totalorder %s1154_s19, %s1148_s14 }
 0x4eb   : > { %p1150_p3 = pnand %p1149_p7, %p1826_p1 }
 0x4ec   : > { %p1157_p2 = por %p1156_p0, %p1155_p13 }
 0x4ed   : > { %p1151_p12 = pneg %p1150_p3 }
 0x4ef   : > { %p1158_p6 = pnand %p1157_p2, %p1151_p12 }
 0x4f1   : > { %1161 = shalt.err (!%p1158_p6)
}
 0x4f2   : > { %s1162_s2 = scalar_lea.hbm %s1662_s27, 16  ;;  %s1166_s11 = scalar_lea.hbm %s1833_s18, 256 }
 0x4f3   : > { %p1163_p10 = scmp.ne.s32.totalorder %s1662_s27, %s1162_s2  ;;  %p1167_p5 = scmp.lt.s32.totalorder %s1662_s27, %s1833_s18 }
 0x4f4   : > { %p1168_p4 = scmp.lt.s32.totalorder %s1166_s11, %s1162_s2 }
 0x4f5   : > { %p1164_p8 = pnand %p1163_p10, %p1826_p1 }
 0x4f6   : > { %p1169_p11 = por %p1168_p4, %p1167_p5 }
 0x4f7   : > { %p1165_p9 = pneg %p1164_p8 }
 0x4f9   : > { %p1170_p7 = pnand %p1169_p11, %p1165_p9 }
 0x4fb   : > { %1173 = shalt.err (!%p1170_p7)
}
 0x4fc   : > { %878 = dma.vmem_to_hbm [thread:$0]  (%p1826_p1), %s665_s25, 16, %s1662_s27, %s1634_s15  }
 0x4fd PF: > { %s1835_s29 = sld [smem:[#allocation20_spill]]  ;;  %p900_p3 = scmp.ge.s32.totalorder %s1300_s7, 2 }
 0x4fe   : > { %s1836_s16 = sld [smem:[#allocation26_spill]] }
 0x503   : > { %s676_s9 = sand.u32 1, %s1835_s29  }
 0x504   : > { %p1837_p12 = scmp.ne.s32.totalorder %s1836_s16, 0  ;;  %s677_s0 = scalar_lea.sflag [#allocation8], %s676_s9 }
 0x506   : > { %p890_p13 = pnand %p900_p3, %p1837_p12 }
 0x508   : > { %p891_p0 = pneg %p890_p13 }
 0x50a   : > { %1239 = dma.done.wait (%p891_p0), %s677_s0, 16  }
 0x50b   : > { %1241 = vsyncadd (%p891_p0), %s677_s0, 4294967280  ;;  %s1838_s1 = sadd.s32 4294967294, %s1300_s7   ;;  %p1839_p2 = scmp.ne.s32.totalorder %s1819_s5, 0 }
 0x50c   : > { %s684_s12 = sand.u32 1, %s1838_s1  }
 0x50d   : > { %p893_p6 = pnand %p900_p3, %p1839_p2  ;;  %s685_s27 = scalar_lea.sflag [#allocation13], %s684_s12 }
 0x50f   : > { %p894_p10 = pneg %p893_p6 }
 0x511   : > { %1243 = dma.done.wait (%p894_p10), %s685_s27, 32  }
 0x512   : > { %1245 = vsyncadd (%p894_p10), %s685_s27, 4294967264  ;;  %s29_s7 = sadd.s32 1, %s1300_s7   ;;  %s1841_s15 = sld [smem:[#allocation19_spill]] }
 0x513   : > { %p1708_p1 = scmp.ge.s32.totalorder %s29_s7, 18   ;;  %s1842_s25 = sld [smem:[#allocation29_spill]] }
 0x514   : > { %s1843_s0 = sld [smem:[#allocation21_spill]]  ;;  %s1850_s20 = smov %s1252_s21 }
 0x515   : > { %s1844_s26 = sld [smem:[#allocation22_spill]]  ;;  %s1851_s21 = smov %s1256_s22 }
 0x516   : > { %s1845_s27 = sld [smem:[#allocation30_spill]]  ;;  %s1852_s22 = smov %s1528_s4 }
 0x517   : > { %s1846_s28 = sld [smem:[#allocation23_spill]]  ;;  %s1853_s23 = smov %s1264_s24 }
 0x518   : > { %s1847_s29 = sld [smem:[#allocation24_spill]]  ;;  %s1854_s24 = smov %s1841_s15 }
 0x519   : > { %s1848_s30 = sld [smem:[#allocation27_spill]]  ;;  %28 = sbr.rel (!%p1708_p1) target bundleno = 21 (0x15), region = 137 }
 0x51a   : > { %s1849_s6 = sld [smem:[#allocation28_spill]] }
 0x51e   :  { %697 = vsyncpa [#allocation7], 1 }
 0x51f   :  { %699 = vsyncpa [#allocation7 + $0x1], 1 }
 0x520   :  { %700 = vsyncpa [#allocation10], 1 }
 0x521   :  { %702 = vsyncpa [#allocation10 + $0x1], 1 }
 0x522   :  { %703 = vsyncpa [#allocation8], 1 }
 0x523   :  { %705 = vsyncpa [#allocation8 + $0x1], 1 }
 0x524   :  { %706 = vsyncpa [#allocation13], 1 }
 0x525   :  { %708 = vsyncpa [#allocation13 + $0x1], 1 }

</bundles_post_ra>
